<compile_context>
chip_gen: v7x
topology: tpu7x:2x2x1
jax: 0.10.0
libtpu: 0.0.40
codegen_flags: <defaults>
</compile_context>

<pallas_src>
import functools
import math

import jax
import jax.numpy as jnp
from jax import lax
from jax.experimental import pallas as pl
from jax.experimental.pallas import tpu as pltpu

EMBED_DIM = 64     # embedding_dim (fasttext vector_size; shrunk for the synthetic test)
HIDDEN = 32        # hidden_size
FC_DIM = 128
NUM_CLASSES = 2
HEAD_PAD = 128     # lane-dense padded width for the final (FC_DIM, 2) GEMM / output


# --------------------------------------------------------------------------
# Fused kernel: biLSTM encode of s1 & s2  ->  |e1 - e2|  ->  MLP head
# --------------------------------------------------------------------------
def _siamese_kernel(x_ref, wih_ref, b_in_ref, whh_ref, w1_ref, b1_ref,
                    w2_ref, b2_ref, out_ref, *, seq_len):
    TBp, D = x_ref.shape[1], x_ref.shape[2]
    Bp = TBp // seq_len            # sublane-padded rows per timestep ([s1 | s2 | pad])
    Bblk = out_ref.shape[0]        # true per-block batch
    H2 = whh_ref.shape[0]          # 2*H  : fused state width = per-gate slab width
    H = H2 // 2
    G2 = whh_ref.shape[1]          # 8*H  : fused gate width (both directions)

    # ---- weights resident for the whole block ----
    wih = wih_ref[...]             # (D, 8H)   interleaved gate cols [i_f i_b | f_f f_b | ...]
    b_in = b_in_ref[...]           # (1, 8H)   bias_ih + bias_hh, same column layout
    whh = whh_ref[...]             # (2H, 8H)  block-diagonal over directions

    # ---- hoisted, time-major input projection: ONE MXU GEMM, biases folded ----
    x = x_ref[0]                                                       # (T*Bp, D)
    xw = jnp.dot(x, wih, preferred_element_type=jnp.float32) + b_in    # (T*Bp, 8H)

    # Within each 2H-wide gate slab the upper H lanes belong to the backward direction
    # and must read the time-reversed projection.
    col = lax.broadcasted_iota(jnp.int32, (1, G2), 1)
    bwd_col = (col % H2) >= H

    # Pre-stitched per-step gate inputs (off the serial chain): fwd lanes read time t,
    # bwd lanes read time T-1-t.  Row slices are sublane-aligned (Bp multiple of 8).
    xg = [jnp.where(bwd_col,
                    xw[(seq_len - 1 - t) * Bp:(seq_len - t) * Bp, :],
                    xw[t * Bp:(t + 1) * Bp, :])
          for t in range(seq_len)]

    h = jnp.zeros((Bp, H2), jnp.float32)   # [h_fwd | h_bwd]
    c = jnp.zeros((Bp, H2), jnp.float32)   # [c_fwd | c_bwd]

    # ---- fully-unrolled recurrence (T static, small): ONE block-diagonal matmul and
    #      ONE combined cell update per step ----
    for t in range(seq_len):
        gates = xg[t] + jnp.dot(h, whh, preferred_element_type=jnp.float32)  # (Bp, 8H)
        sg = jax.nn.sigmoid(gates)       # activations over the full gate slab, then slice
        tg = jnp.tanh(gates)
        i = sg[:, 0 * H2:1 * H2]
        f = sg[:, 1 * H2:2 * H2]
        g = tg[:, 2 * H2:3 * H2]
        o = sg[:, 3 * H2:4 * H2]
        c = f * c + i * g
        h = o * jnp.tanh(c)

    # h is already torch.cat((h_forward, h_backward), dim=1); rows = [s1 | s2 | pad].
    diff = jnp.abs(h[0:Bblk, :] - h[Bblk:2 * Bblk, :])                 # (Bblk, 2H)
    hid = jnp.maximum(
        jnp.dot(diff, w1_ref[...], preferred_element_type=jnp.float32) + b1_ref[...],
        0.0)
    # nn.Dropout(0.3): identity in eval mode.
    out_ref[...] = (jnp.dot(hid, w2_ref[...], preferred_element_type=jnp.float32)
                    + b2_ref[...])                                     # lane-dense store


# --------------------------------------------------------------------------
# Wrapper: batch grid (parallel) + wrapper-side time-major / row-padded layout
# --------------------------------------------------------------------------
def siamese_forward(params, s1, s2, *, batch_block=None):
    """s1, s2: (B, T, D) batch-first float32 -> (B, NUM_CLASSES) logits.

    batch_block: per-grid-step batch; production should use >=128 (v5e) / >=256
    (v6e/v7x) and a multiple of 8.  Defaults to B (single block, optimal at B=2).
    """
    B, T, D = s1.shape
    if batch_block is None:
        batch_block = B
    assert B % batch_block == 0
    nblk = B // batch_block
    Bp = ((2 * batch_block + 7) // 8) * 8          # sublane-aligned rows per timestep

    # One wrapper-side layout pass (XLA): per block, a time-major (T*Bp, D) row slab
    # with rows ordered [s1 batch | s2 batch | zero pad] for every timestep.
    s1b = s1.reshape(nblk, batch_block, T, D)
    s2b = s2.reshape(nblk, batch_block, T, D)
    x = jnp.concatenate([s1b, s2b], axis=1)                            # (nblk, 2Bb, T, D)
    if Bp > 2 * batch_block:
        x = jnp.pad(x, ((0, 0), (0, Bp - 2 * batch_block), (0, 0), (0, 0)))
    x = jnp.transpose(x, (0, 2, 1, 3)).reshape(nblk, T * Bp, D)        # (nblk, T*Bp, D)

    def rep(a):  # weight replicated across the batch grid
        return pl.BlockSpec(a.shape, lambda i: (0,) * a.ndim)

    out_pad = pl.pallas_call(
        functools.partial(_siamese_kernel, seq_len=T),
        out_shape=jax.ShapeDtypeStruct((B, HEAD_PAD), jnp.float32),
        grid=(nblk,),
        in_specs=[
            pl.BlockSpec((1, T * Bp, D), lambda i: (i, 0, 0)),
            rep(params["wih"]), rep(params["b_in"]), rep(params["whh"]),
            rep(params["w1"]), rep(params["b1"]),
            rep(params["w2p"]), rep(params["b2p"]),
        ],
        out_specs=pl.BlockSpec((batch_block, HEAD_PAD), lambda i: (i, 0)),
        compiler_params=pltpu.CompilerParams(
            dimension_semantics=("parallel",),          # shards batch blocks over v7x TCs
            vmem_limit_bytes=32 * 1024 * 1024),         # explicit budget (fits all gens)
    )(x, params["wih"], params["b_in"], params["whh"],
      params["w1"], params["b1"], params["w2p"], params["b2p"])
    return out_pad[:, :NUM_CLASSES]


# --------------------------------------------------------------------------
# Parameter init (PyTorch-style U(-1/sqrt(fan), 1/sqrt(fan))) + kernel packing
# --------------------------------------------------------------------------
def init_params(key):
    def u(k, shape, bound):
        return jax.random.uniform(k, shape, jnp.float32, -bound, bound)

    ks = jax.random.split(key, 12)
    kl = 1.0 / math.sqrt(HIDDEN)
    return {
        # weights stored transposed for right-multiplication, gate order i,f,g,o
        "wih_f": u(ks[0], (EMBED_DIM, 4 * HIDDEN), kl),
        "whh_f": u(ks[1], (HIDDEN, 4 * HIDDEN), kl),
        "b_f": u(ks[2], (1, 4 * HIDDEN), kl) + u(ks[3], (1, 4 * HIDDEN), kl),
        "wih_b": u(ks[4], (EMBED_DIM, 4 * HIDDEN), kl),
        "whh_b": u(ks[5], (HIDDEN, 4 * HIDDEN), kl),
        "b_b": u(ks[6], (1, 4 * HIDDEN), kl) + u(ks[7], (1, 4 * HIDDEN), kl),
        "w1": u(ks[8], (2 * HIDDEN, FC_DIM), 1.0 / math.sqrt(2 * HIDDEN)),
        "b1": u(ks[9], (1, FC_DIM), 1.0 / math.sqrt(2 * HIDDEN)),
        "w2": u(ks[10], (FC_DIM, NUM_CLASSES), 1.0 / math.sqrt(FC_DIM)),
        "b2": u(ks[11], (1, NUM_CLASSES), 1.0 / math.sqrt(FC_DIM)),
    }


def pack_params(raw):
    """Pack raw (PyTorch-layout) params into the fused-direction kernel layout."""
    H = HIDDEN

    # Interleaved gate columns [i_f i_b | f_f f_b | g_f g_b | o_f o_b]: the fused
    # (fwd|bwd) cell update then uses contiguous 2H-lane slices per gate.
    def interleave(wf, wb):
        return jnp.concatenate(
            [w[:, k * H:(k + 1) * H] for k in range(4) for w in (wf, wb)], axis=1)

    wih = interleave(raw["wih_f"], raw["wih_b"])          # (D, 8H)
    b_in = interleave(raw["b_f"], raw["b_b"])             # (1, 8H)

    # Block-diagonal recurrent weight: h_fwd rows feed only *_f gate columns,
    # h_bwd rows only *_b columns.
    whh = jnp.zeros((2 * H, 8 * H), jnp.float32)
    for k in range(4):
        whh = whh.at[0:H, (2 * k) * H:(2 * k + 1) * H].set(
            raw["whh_f"][:, k * H:(k + 1) * H])
        whh = whh.at[H:2 * H, (2 * k + 1) * H:(2 * k + 2) * H].set(
            raw["whh_b"][:, k * H:(k + 1) * H])

    w2p = jnp.zeros((FC_DIM, HEAD_PAD), jnp.float32).at[:, :NUM_CLASSES].set(raw["w2"])
    b2p = jnp.zeros((1, HEAD_PAD), jnp.float32).at[:, :NUM_CLASSES].set(raw["b2"])
    # TODO(synk): at production scale cast wih/whh/w1/w2p to bfloat16 here (MXU inputs
    # with f32 accumulation); cell state / elementwise math stays f32 in the kernel.
    return {"wih": wih, "b_in": b_in, "whh": whh,
            "w1": raw["w1"], "b1": raw["b1"], "w2p": w2p, "b2p": b2p}


# --------------------------------------------------------------------------
# Pure-JAX reference (for correctness check)
# --------------------------------------------------------------------------
def _ref_encode(raw, x, suffix):
    wih, whh, b = raw["wih_" + suffix], raw["whh_" + suffix], raw["b_" + suffix]
    B = x.shape[0]
    H = HIDDEN

    def cell(carry, x_t):
        h, c = carry
        gates = x_t @ wih + h @ whh + b
        i = jax.nn.sigmoid(gates[:, 0 * H:1 * H])
        f = jax.nn.sigmoid(gates[:, 1 * H:2 * H])
        g = jnp.tanh(gates[:, 2 * H:3 * H])
        o = jax.nn.sigmoid(gates[:, 3 * H:4 * H])
        c_new = f * c + i * g
        h_new = o * jnp.tanh(c_new)
        return (h_new, c_new), None

    init = (jnp.zeros((B, H), jnp.float32), jnp.zeros((B, H), jnp.float32))
    xs = jnp.transpose(x, (1, 0, 2))
    if suffix == "b":
        xs = xs[::-1]
    (h, _), _ = lax.scan(cell, init, xs)
    return h


def reference_forward(raw, s1, s2):
    def enc(x):
        return jnp.concatenate([_ref_encode(raw, x, "f"), _ref_encode(raw, x, "b")],
                               axis=1)

    diff = jnp.abs(enc(s1) - enc(s2))
    h = jnp.maximum(diff @ raw["w1"] + raw["b1"], 0.0)
    return h @ raw["w2"] + raw["b2"]


# --------------------------------------------------------------------------
if __name__ == "__main__":
    B, T = 2, 8
    key = jax.random.PRNGKey(0)
    kp, k1, k2 = jax.random.split(key, 3)
    raw = init_params(kp)
    params = pack_params(raw)
    s1 = jax.random.normal(k1, (B, T, EMBED_DIM), jnp.float32)
    s2 = jax.random.normal(k2, (B, T, EMBED_DIM), jnp.float32)

    out = jax.jit(siamese_forward)(params, s1, s2)
    out = jax.block_until_ready(out)

    ref = reference_forward(raw, s1, s2)
    assert out.shape == (B, NUM_CLASSES), out.shape
    assert jnp.allclose(out, ref, rtol=1e-3, atol=1e-3), (out, ref)

    print("KERNEL_OK")
</pallas_src>

<mosaic_0001>
module attributes {stable_mosaic.version = 11 : i64} {
  func.func @_siamese_kernel(%arg0: i32, %arg1: memref<1x64x64xf32, #tpu.memory_space<vmem>>, %arg2: memref<64x256xf32, #tpu.memory_space<vmem>>, %arg3: memref<1x256xf32, #tpu.memory_space<vmem>>, %arg4: memref<64x256xf32, #tpu.memory_space<vmem>>, %arg5: memref<64x128xf32, #tpu.memory_space<vmem>>, %arg6: memref<1x128xf32, #tpu.memory_space<vmem>>, %arg7: memref<128x128xf32, #tpu.memory_space<vmem>>, %arg8: memref<1x128xf32, #tpu.memory_space<vmem>>, %arg9: memref<2x128xf32, #tpu.memory_space<vmem>>) attributes {dimension_semantics = [#tpu.dimension_semantics<parallel>], iteration_bounds = array<i64: 1>, scalar_prefetch = 0 : i64, scratch_operands = 0 : i64, tpu.core_type = #tpu.core_type<tc>, window_params = [{transform_indices = @transform_0, window_bounds = array<i64: 1, 64, 64>}, {pipeline_mode = #tpu.pipeline_mode<synchronous>, transform_indices = @transform_1, window_bounds = array<i64: 64, 256>}, {pipeline_mode = #tpu.pipeline_mode<synchronous>, transform_indices = @transform_2, window_bounds = array<i64: 1, 256>}, {pipeline_mode = #tpu.pipeline_mode<synchronous>, transform_indices = @transform_3, window_bounds = array<i64: 64, 256>}, {pipeline_mode = #tpu.pipeline_mode<synchronous>, transform_indices = @transform_4, window_bounds = array<i64: 64, 128>}, {pipeline_mode = #tpu.pipeline_mode<synchronous>, transform_indices = @transform_5, window_bounds = array<i64: 1, 128>}, {pipeline_mode = #tpu.pipeline_mode<synchronous>, transform_indices = @transform_6, window_bounds = array<i64: 128, 128>}, {pipeline_mode = #tpu.pipeline_mode<synchronous>, transform_indices = @transform_7, window_bounds = array<i64: 1, 128>}, {transform_indices = @transform_8, window_bounds = array<i64: 2, 128>}]} {
    %c0 = arith.constant 0 : index
    %c0_0 = arith.constant 0 : index
    %0 = vector.load %arg2[%c0, %c0_0] : memref<64x256xf32, #tpu.memory_space<vmem>>, vector<64x256xf32>
    %c0_1 = arith.constant 0 : index
    %c0_2 = arith.constant 0 : index
    %1 = vector.load %arg3[%c0_1, %c0_2] : memref<1x256xf32, #tpu.memory_space<vmem>>, vector<1x256xf32>
    %c0_3 = arith.constant 0 : index
    %c0_4 = arith.constant 0 : index
    %2 = vector.load %arg4[%c0_3, %c0_4] : memref<64x256xf32, #tpu.memory_space<vmem>>, vector<64x256xf32>
    %c0_5 = arith.constant 0 : index
    %c0_6 = arith.constant 0 : index
    %c0_7 = arith.constant 0 : index
    %3 = vector.load %arg1[%c0_5, %c0_6, %c0_7] : memref<1x64x64xf32, #tpu.memory_space<vmem>>, vector<1x64x64xf32>
    %4 = vector.shape_cast %3 : vector<1x64x64xf32> to vector<64x64xf32>
    %cst = arith.constant dense<0.000000e+00> : vector<64x256xf32>
    %5 = tpu.matmul %4, %0, %cst {dimension_numbers = #tpu.dot_dimension_numbers<[1], [0], [0], [1], [0, 0, 1, 1], [], []>} : vector<64x64xf32>, vector<64x256xf32>, vector<64x256xf32> -> vector<64x256xf32>
    %6 = vector.broadcast %1 : vector<1x256xf32> to vector<64x256xf32>
    %7 = arith.addf %5, %6 : vector<64x256xf32>
    %8 = tpu.iota {dimensions = array<i32: 1>} : vector<1x256xi32>
    %c64_i32 = arith.constant 64 : i32
    %c0_i32 = arith.constant 0 : i32
    %9 = arith.cmpi eq, %c64_i32, %c0_i32 : i32
    %c1_i32 = arith.constant 1 : i32
    %10 = arith.select %9, %c1_i32, %c64_i32 : i32
    %11 = vector.broadcast %10 : i32 to vector<1x256xi32>
    %12 = arith.remsi %8, %11 : vector<1x256xi32>
    %c0_i32_8 = arith.constant 0 : i32
    %13 = vector.broadcast %c0_i32_8 : i32 to vector<1x256xi32>
    %14 = arith.cmpi ne, %12, %13 : vector<1x256xi32>
    %c0_i32_9 = arith.constant 0 : i32
    %15 = vector.broadcast %c0_i32_9 : i32 to vector<1x256xi32>
    %16 = arith.cmpi slt, %12, %15 : vector<1x256xi32>
    %c0_i32_10 = arith.constant 0 : i32
    %17 = arith.cmpi slt, %10, %c0_i32_10 : i32
    %18 = vector.broadcast %17 : i1 to vector<1x256xi1>
    %19 = vector.broadcast %18 : vector<1x256xi1> to vector<1x256xi1>
    %20 = arith.xori %16, %19 : vector<1x256xi1>
    %21 = arith.andi %20, %14 : vector<1x256xi1>
    %22 = vector.broadcast %10 : i32 to vector<1x256xi32>
    %23 = arith.addi %12, %22 : vector<1x256xi32>
    %24 = arith.select %21, %23, %12 : vector<1x256xi1>, vector<1x256xi32>
    %c32_i32 = arith.constant 32 : i32
    %25 = vector.broadcast %c32_i32 : i32 to vector<1x256xi32>
    %26 = arith.cmpi sge, %24, %25 : vector<1x256xi32>
    %27 = vector.extract_strided_slice %7 {offsets = [56, 0], sizes = [8, 256], strides = [1, 1]} : vector<64x256xf32> to vector<8x256xf32>
    %28 = vector.extract_strided_slice %7 {offsets = [0, 0], sizes = [8, 256], strides = [1, 1]} : vector<64x256xf32> to vector<8x256xf32>
    %29 = vector.shape_cast %26 : vector<1x256xi1> to vector<1x256xi1>
    %30 = vector.broadcast %29 : vector<1x256xi1> to vector<8x256xi1>
    %31 = arith.select %30, %27, %28 : vector<8x256xi1>, vector<8x256xf32>
    %32 = vector.extract_strided_slice %7 {offsets = [48, 0], sizes = [8, 256], strides = [1, 1]} : vector<64x256xf32> to vector<8x256xf32>
    %33 = vector.extract_strided_slice %7 {offsets = [8, 0], sizes = [8, 256], strides = [1, 1]} : vector<64x256xf32> to vector<8x256xf32>
    %34 = vector.shape_cast %26 : vector<1x256xi1> to vector<1x256xi1>
    %35 = vector.broadcast %34 : vector<1x256xi1> to vector<8x256xi1>
    %36 = arith.select %35, %32, %33 : vector<8x256xi1>, vector<8x256xf32>
    %37 = vector.extract_strided_slice %7 {offsets = [40, 0], sizes = [8, 256], strides = [1, 1]} : vector<64x256xf32> to vector<8x256xf32>
    %38 = vector.extract_strided_slice %7 {offsets = [16, 0], sizes = [8, 256], strides = [1, 1]} : vector<64x256xf32> to vector<8x256xf32>
    %39 = vector.shape_cast %26 : vector<1x256xi1> to vector<1x256xi1>
    %40 = vector.broadcast %39 : vector<1x256xi1> to vector<8x256xi1>
    %41 = arith.select %40, %37, %38 : vector<8x256xi1>, vector<8x256xf32>
    %42 = vector.extract_strided_slice %7 {offsets = [32, 0], sizes = [8, 256], strides = [1, 1]} : vector<64x256xf32> to vector<8x256xf32>
    %43 = vector.extract_strided_slice %7 {offsets = [24, 0], sizes = [8, 256], strides = [1, 1]} : vector<64x256xf32> to vector<8x256xf32>
    %44 = vector.shape_cast %26 : vector<1x256xi1> to vector<1x256xi1>
    %45 = vector.broadcast %44 : vector<1x256xi1> to vector<8x256xi1>
    %46 = arith.select %45, %42, %43 : vector<8x256xi1>, vector<8x256xf32>
    %47 = vector.extract_strided_slice %7 {offsets = [24, 0], sizes = [8, 256], strides = [1, 1]} : vector<64x256xf32> to vector<8x256xf32>
    %48 = vector.extract_strided_slice %7 {offsets = [32, 0], sizes = [8, 256], strides = [1, 1]} : vector<64x256xf32> to vector<8x256xf32>
    %49 = vector.shape_cast %26 : vector<1x256xi1> to vector<1x256xi1>
    %50 = vector.broadcast %49 : vector<1x256xi1> to vector<8x256xi1>
    %51 = arith.select %50, %47, %48 : vector<8x256xi1>, vector<8x256xf32>
    %52 = vector.extract_strided_slice %7 {offsets = [16, 0], sizes = [8, 256], strides = [1, 1]} : vector<64x256xf32> to vector<8x256xf32>
    %53 = vector.extract_strided_slice %7 {offsets = [40, 0], sizes = [8, 256], strides = [1, 1]} : vector<64x256xf32> to vector<8x256xf32>
    %54 = vector.shape_cast %26 : vector<1x256xi1> to vector<1x256xi1>
    %55 = vector.broadcast %54 : vector<1x256xi1> to vector<8x256xi1>
    %56 = arith.select %55, %52, %53 : vector<8x256xi1>, vector<8x256xf32>
    %57 = vector.extract_strided_slice %7 {offsets = [8, 0], sizes = [8, 256], strides = [1, 1]} : vector<64x256xf32> to vector<8x256xf32>
    %58 = vector.extract_strided_slice %7 {offsets = [48, 0], sizes = [8, 256], strides = [1, 1]} : vector<64x256xf32> to vector<8x256xf32>
    %59 = vector.shape_cast %26 : vector<1x256xi1> to vector<1x256xi1>
    %60 = vector.broadcast %59 : vector<1x256xi1> to vector<8x256xi1>
    %61 = arith.select %60, %57, %58 : vector<8x256xi1>, vector<8x256xf32>
    %62 = vector.extract_strided_slice %7 {offsets = [0, 0], sizes = [8, 256], strides = [1, 1]} : vector<64x256xf32> to vector<8x256xf32>
    %63 = vector.extract_strided_slice %7 {offsets = [56, 0], sizes = [8, 256], strides = [1, 1]} : vector<64x256xf32> to vector<8x256xf32>
    %64 = vector.shape_cast %26 : vector<1x256xi1> to vector<1x256xi1>
    %65 = vector.broadcast %64 : vector<1x256xi1> to vector<8x256xi1>
    %66 = arith.select %65, %62, %63 : vector<8x256xi1>, vector<8x256xf32>
    %cst_11 = arith.constant 0.000000e+00 : f32
    %67 = vector.broadcast %cst_11 : f32 to vector<8x64xf32>
    %cst_12 = arith.constant 0.000000e+00 : f32
    %68 = vector.broadcast %cst_12 : f32 to vector<8x64xf32>
    %cst_13 = arith.constant dense<0.000000e+00> : vector<8x256xf32>
    %69 = tpu.matmul %67, %2, %cst_13 {dimension_numbers = #tpu.dot_dimension_numbers<[1], [0], [0], [1], [0, 0, 1, 1], [], []>} : vector<8x64xf32>, vector<64x256xf32>, vector<8x256xf32> -> vector<8x256xf32>
    %70 = arith.addf %31, %69 : vector<8x256xf32>
    %71 = arith.negf %70 : vector<8x256xf32>
    %72 = math.exp %71 : vector<8x256xf32>
    %cst_14 = arith.constant 1.000000e+00 : f32
    %73 = vector.broadcast %cst_14 : f32 to vector<8x256xf32>
    %74 = arith.addf %73, %72 : vector<8x256xf32>
    %75 = arith.divf %73, %74 : vector<8x256xf32>
    %76 = math.tanh %70 : vector<8x256xf32>
    %77 = vector.extract_strided_slice %75 {offsets = [0, 0], sizes = [8, 64], strides = [1, 1]} : vector<8x256xf32> to vector<8x64xf32>
    %78 = vector.extract_strided_slice %75 {offsets = [0, 64], sizes = [8, 64], strides = [1, 1]} : vector<8x256xf32> to vector<8x64xf32>
    %79 = vector.extract_strided_slice %76 {offsets = [0, 128], sizes = [8, 64], strides = [1, 1]} : vector<8x256xf32> to vector<8x64xf32>
    %80 = vector.extract_strided_slice %75 {offsets = [0, 192], sizes = [8, 64], strides = [1, 1]} : vector<8x256xf32> to vector<8x64xf32>
    %81 = arith.mulf %78, %68 : vector<8x64xf32>
    %82 = arith.mulf %77, %79 : vector<8x64xf32>
    %83 = arith.addf %81, %82 : vector<8x64xf32>
    %84 = math.tanh %83 : vector<8x64xf32>
    %85 = arith.mulf %80, %84 : vector<8x64xf32>
    %cst_15 = arith.constant dense<0.000000e+00> : vector<8x256xf32>
    %86 = tpu.matmul %85, %2, %cst_15 {dimension_numbers = #tpu.dot_dimension_numbers<[1], [0], [0], [1], [0, 0, 1, 1], [], []>} : vector<8x64xf32>, vector<64x256xf32>, vector<8x256xf32> -> vector<8x256xf32>
    %87 = arith.addf %36, %86 : vector<8x256xf32>
    %88 = arith.negf %87 : vector<8x256xf32>
    %89 = math.exp %88 : vector<8x256xf32>
    %cst_16 = arith.constant 1.000000e+00 : f32
    %90 = vector.broadcast %cst_16 : f32 to vector<8x256xf32>
    %91 = arith.addf %90, %89 : vector<8x256xf32>
    %92 = arith.divf %90, %91 : vector<8x256xf32>
    %93 = math.tanh %87 : vector<8x256xf32>
    %94 = vector.extract_strided_slice %92 {offsets = [0, 0], sizes = [8, 64], strides = [1, 1]} : vector<8x256xf32> to vector<8x64xf32>
    %95 = vector.extract_strided_slice %92 {offsets = [0, 64], sizes = [8, 64], strides = [1, 1]} : vector<8x256xf32> to vector<8x64xf32>
    %96 = vector.extract_strided_slice %93 {offsets = [0, 128], sizes = [8, 64], strides = [1, 1]} : vector<8x256xf32> to vector<8x64xf32>
    %97 = vector.extract_strided_slice %92 {offsets = [0, 192], sizes = [8, 64], strides = [1, 1]} : vector<8x256xf32> to vector<8x64xf32>
    %98 = arith.mulf %95, %83 : vector<8x64xf32>
    %99 = arith.mulf %94, %96 : vector<8x64xf32>
    %100 = arith.addf %98, %99 : vector<8x64xf32>
    %101 = math.tanh %100 : vector<8x64xf32>
    %102 = arith.mulf %97, %101 : vector<8x64xf32>
    %cst_17 = arith.constant dense<0.000000e+00> : vector<8x256xf32>
    %103 = tpu.matmul %102, %2, %cst_17 {dimension_numbers = #tpu.dot_dimension_numbers<[1], [0], [0], [1], [0, 0, 1, 1], [], []>} : vector<8x64xf32>, vector<64x256xf32>, vector<8x256xf32> -> vector<8x256xf32>
    %104 = arith.addf %41, %103 : vector<8x256xf32>
    %105 = arith.negf %104 : vector<8x256xf32>
    %106 = math.exp %105 : vector<8x256xf32>
    %cst_18 = arith.constant 1.000000e+00 : f32
    %107 = vector.broadcast %cst_18 : f32 to vector<8x256xf32>
    %108 = arith.addf %107, %106 : vector<8x256xf32>
    %109 = arith.divf %107, %108 : vector<8x256xf32>
    %110 = math.tanh %104 : vector<8x256xf32>
    %111 = vector.extract_strided_slice %109 {offsets = [0, 0], sizes = [8, 64], strides = [1, 1]} : vector<8x256xf32> to vector<8x64xf32>
    %112 = vector.extract_strided_slice %109 {offsets = [0, 64], sizes = [8, 64], strides = [1, 1]} : vector<8x256xf32> to vector<8x64xf32>
    %113 = vector.extract_strided_slice %110 {offsets = [0, 128], sizes = [8, 64], strides = [1, 1]} : vector<8x256xf32> to vector<8x64xf32>
    %114 = vector.extract_strided_slice %109 {offsets = [0, 192], sizes = [8, 64], strides = [1, 1]} : vector<8x256xf32> to vector<8x64xf32>
    %115 = arith.mulf %112, %100 : vector<8x64xf32>
    %116 = arith.mulf %111, %113 : vector<8x64xf32>
    %117 = arith.addf %115, %116 : vector<8x64xf32>
    %118 = math.tanh %117 : vector<8x64xf32>
    %119 = arith.mulf %114, %118 : vector<8x64xf32>
    %cst_19 = arith.constant dense<0.000000e+00> : vector<8x256xf32>
    %120 = tpu.matmul %119, %2, %cst_19 {dimension_numbers = #tpu.dot_dimension_numbers<[1], [0], [0], [1], [0, 0, 1, 1], [], []>} : vector<8x64xf32>, vector<64x256xf32>, vector<8x256xf32> -> vector<8x256xf32>
    %121 = arith.addf %46, %120 : vector<8x256xf32>
    %122 = arith.negf %121 : vector<8x256xf32>
    %123 = math.exp %122 : vector<8x256xf32>
    %cst_20 = arith.constant 1.000000e+00 : f32
    %124 = vector.broadcast %cst_20 : f32 to vector<8x256xf32>
    %125 = arith.addf %124, %123 : vector<8x256xf32>
    %126 = arith.divf %124, %125 : vector<8x256xf32>
    %127 = math.tanh %121 : vector<8x256xf32>
    %128 = vector.extract_strided_slice %126 {offsets = [0, 0], sizes = [8, 64], strides = [1, 1]} : vector<8x256xf32> to vector<8x64xf32>
    %129 = vector.extract_strided_slice %126 {offsets = [0, 64], sizes = [8, 64], strides = [1, 1]} : vector<8x256xf32> to vector<8x64xf32>
    %130 = vector.extract_strided_slice %127 {offsets = [0, 128], sizes = [8, 64], strides = [1, 1]} : vector<8x256xf32> to vector<8x64xf32>
    %131 = vector.extract_strided_slice %126 {offsets = [0, 192], sizes = [8, 64], strides = [1, 1]} : vector<8x256xf32> to vector<8x64xf32>
    %132 = arith.mulf %129, %117 : vector<8x64xf32>
    %133 = arith.mulf %128, %130 : vector<8x64xf32>
    %134 = arith.addf %132, %133 : vector<8x64xf32>
    %135 = math.tanh %134 : vector<8x64xf32>
    %136 = arith.mulf %131, %135 : vector<8x64xf32>
    %cst_21 = arith.constant dense<0.000000e+00> : vector<8x256xf32>
    %137 = tpu.matmul %136, %2, %cst_21 {dimension_numbers = #tpu.dot_dimension_numbers<[1], [0], [0], [1], [0, 0, 1, 1], [], []>} : vector<8x64xf32>, vector<64x256xf32>, vector<8x256xf32> -> vector<8x256xf32>
    %138 = arith.addf %51, %137 : vector<8x256xf32>
    %139 = arith.negf %138 : vector<8x256xf32>
    %140 = math.exp %139 : vector<8x256xf32>
    %cst_22 = arith.constant 1.000000e+00 : f32
    %141 = vector.broadcast %cst_22 : f32 to vector<8x256xf32>
    %142 = arith.addf %141, %140 : vector<8x256xf32>
    %143 = arith.divf %141, %142 : vector<8x256xf32>
    %144 = math.tanh %138 : vector<8x256xf32>
    %145 = vector.extract_strided_slice %143 {offsets = [0, 0], sizes = [8, 64], strides = [1, 1]} : vector<8x256xf32> to vector<8x64xf32>
    %146 = vector.extract_strided_slice %143 {offsets = [0, 64], sizes = [8, 64], strides = [1, 1]} : vector<8x256xf32> to vector<8x64xf32>
    %147 = vector.extract_strided_slice %144 {offsets = [0, 128], sizes = [8, 64], strides = [1, 1]} : vector<8x256xf32> to vector<8x64xf32>
    %148 = vector.extract_strided_slice %143 {offsets = [0, 192], sizes = [8, 64], strides = [1, 1]} : vector<8x256xf32> to vector<8x64xf32>
    %149 = arith.mulf %146, %134 : vector<8x64xf32>
    %150 = arith.mulf %145, %147 : vector<8x64xf32>
    %151 = arith.addf %149, %150 : vector<8x64xf32>
    %152 = math.tanh %151 : vector<8x64xf32>
    %153 = arith.mulf %148, %152 : vector<8x64xf32>
    %cst_23 = arith.constant dense<0.000000e+00> : vector<8x256xf32>
    %154 = tpu.matmul %153, %2, %cst_23 {dimension_numbers = #tpu.dot_dimension_numbers<[1], [0], [0], [1], [0, 0, 1, 1], [], []>} : vector<8x64xf32>, vector<64x256xf32>, vector<8x256xf32> -> vector<8x256xf32>
    %155 = arith.addf %56, %154 : vector<8x256xf32>
    %156 = arith.negf %155 : vector<8x256xf32>
    %157 = math.exp %156 : vector<8x256xf32>
    %cst_24 = arith.constant 1.000000e+00 : f32
    %158 = vector.broadcast %cst_24 : f32 to vector<8x256xf32>
    %159 = arith.addf %158, %157 : vector<8x256xf32>
    %160 = arith.divf %158, %159 : vector<8x256xf32>
    %161 = math.tanh %155 : vector<8x256xf32>
    %162 = vector.extract_strided_slice %160 {offsets = [0, 0], sizes = [8, 64], strides = [1, 1]} : vector<8x256xf32> to vector<8x64xf32>
    %163 = vector.extract_strided_slice %160 {offsets = [0, 64], sizes = [8, 64], strides = [1, 1]} : vector<8x256xf32> to vector<8x64xf32>
    %164 = vector.extract_strided_slice %161 {offsets = [0, 128], sizes = [8, 64], strides = [1, 1]} : vector<8x256xf32> to vector<8x64xf32>
    %165 = vector.extract_strided_slice %160 {offsets = [0, 192], sizes = [8, 64], strides = [1, 1]} : vector<8x256xf32> to vector<8x64xf32>
    %166 = arith.mulf %163, %151 : vector<8x64xf32>
    %167 = arith.mulf %162, %164 : vector<8x64xf32>
    %168 = arith.addf %166, %167 : vector<8x64xf32>
    %169 = math.tanh %168 : vector<8x64xf32>
    %170 = arith.mulf %165, %169 : vector<8x64xf32>
    %cst_25 = arith.constant dense<0.000000e+00> : vector<8x256xf32>
    %171 = tpu.matmul %170, %2, %cst_25 {dimension_numbers = #tpu.dot_dimension_numbers<[1], [0], [0], [1], [0, 0, 1, 1], [], []>} : vector<8x64xf32>, vector<64x256xf32>, vector<8x256xf32> -> vector<8x256xf32>
    %172 = arith.addf %61, %171 : vector<8x256xf32>
    %173 = arith.negf %172 : vector<8x256xf32>
    %174 = math.exp %173 : vector<8x256xf32>
    %cst_26 = arith.constant 1.000000e+00 : f32
    %175 = vector.broadcast %cst_26 : f32 to vector<8x256xf32>
    %176 = arith.addf %175, %174 : vector<8x256xf32>
    %177 = arith.divf %175, %176 : vector<8x256xf32>
    %178 = math.tanh %172 : vector<8x256xf32>
    %179 = vector.extract_strided_slice %177 {offsets = [0, 0], sizes = [8, 64], strides = [1, 1]} : vector<8x256xf32> to vector<8x64xf32>
    %180 = vector.extract_strided_slice %177 {offsets = [0, 64], sizes = [8, 64], strides = [1, 1]} : vector<8x256xf32> to vector<8x64xf32>
    %181 = vector.extract_strided_slice %178 {offsets = [0, 128], sizes = [8, 64], strides = [1, 1]} : vector<8x256xf32> to vector<8x64xf32>
    %182 = vector.extract_strided_slice %177 {offsets = [0, 192], sizes = [8, 64], strides = [1, 1]} : vector<8x256xf32> to vector<8x64xf32>
    %183 = arith.mulf %180, %168 : vector<8x64xf32>
    %184 = arith.mulf %179, %181 : vector<8x64xf32>
    %185 = arith.addf %183, %184 : vector<8x64xf32>
    %186 = math.tanh %185 : vector<8x64xf32>
    %187 = arith.mulf %182, %186 : vector<8x64xf32>
    %cst_27 = arith.constant dense<0.000000e+00> : vector<8x256xf32>
    %188 = tpu.matmul %187, %2, %cst_27 {dimension_numbers = #tpu.dot_dimension_numbers<[1], [0], [0], [1], [0, 0, 1, 1], [], []>} : vector<8x64xf32>, vector<64x256xf32>, vector<8x256xf32> -> vector<8x256xf32>
    %189 = arith.addf %66, %188 : vector<8x256xf32>
    %190 = arith.negf %189 : vector<8x256xf32>
    %191 = math.exp %190 : vector<8x256xf32>
    %cst_28 = arith.constant 1.000000e+00 : f32
    %192 = vector.broadcast %cst_28 : f32 to vector<8x256xf32>
    %193 = arith.addf %192, %191 : vector<8x256xf32>
    %194 = arith.divf %192, %193 : vector<8x256xf32>
    %195 = math.tanh %189 : vector<8x256xf32>
    %196 = vector.extract_strided_slice %194 {offsets = [0, 0], sizes = [8, 64], strides = [1, 1]} : vector<8x256xf32> to vector<8x64xf32>
    %197 = vector.extract_strided_slice %194 {offsets = [0, 64], sizes = [8, 64], strides = [1, 1]} : vector<8x256xf32> to vector<8x64xf32>
    %198 = vector.extract_strided_slice %195 {offsets = [0, 128], sizes = [8, 64], strides = [1, 1]} : vector<8x256xf32> to vector<8x64xf32>
    %199 = vector.extract_strided_slice %194 {offsets = [0, 192], sizes = [8, 64], strides = [1, 1]} : vector<8x256xf32> to vector<8x64xf32>
    %200 = arith.mulf %197, %185 : vector<8x64xf32>
    %201 = arith.mulf %196, %198 : vector<8x64xf32>
    %202 = arith.addf %200, %201 : vector<8x64xf32>
    %203 = math.tanh %202 : vector<8x64xf32>
    %204 = arith.mulf %199, %203 : vector<8x64xf32>
    %205 = vector.extract_strided_slice %204 {offsets = [0, 0], sizes = [2, 64], strides = [1, 1]} : vector<8x64xf32> to vector<2x64xf32>
    %206 = vector.extract_strided_slice %204 {offsets = [2, 0], sizes = [2, 64], strides = [1, 1]} : vector<8x64xf32> to vector<2x64xf32>
    %207 = arith.subf %205, %206 : vector<2x64xf32>
    %208 = math.absf %207 : vector<2x64xf32>
    %c0_29 = arith.constant 0 : index
    %c0_30 = arith.constant 0 : index
    %209 = vector.load %arg5[%c0_29, %c0_30] : memref<64x128xf32, #tpu.memory_space<vmem>>, vector<64x128xf32>
    %cst_31 = arith.constant dense<0.000000e+00> : vector<2x128xf32>
    %210 = tpu.matmul %208, %209, %cst_31 {dimension_numbers = #tpu.dot_dimension_numbers<[1], [0], [0], [1], [0, 0, 1, 1], [], []>} : vector<2x64xf32>, vector<64x128xf32>, vector<2x128xf32> -> vector<2x128xf32>
    %c0_32 = arith.constant 0 : index
    %c0_33 = arith.constant 0 : index
    %211 = vector.load %arg6[%c0_32, %c0_33] : memref<1x128xf32, #tpu.memory_space<vmem>>, vector<1x128xf32>
    %212 = vector.broadcast %211 : vector<1x128xf32> to vector<2x128xf32>
    %213 = arith.addf %210, %212 : vector<2x128xf32>
    %cst_34 = arith.constant 0.000000e+00 : f32
    %214 = vector.broadcast %cst_34 : f32 to vector<2x128xf32>
    %215 = arith.maximumf %213, %214 : vector<2x128xf32>
    %c0_35 = arith.constant 0 : index
    %c0_36 = arith.constant 0 : index
    %216 = vector.load %arg7[%c0_35, %c0_36] : memref<128x128xf32, #tpu.memory_space<vmem>>, vector<128x128xf32>
    %cst_37 = arith.constant dense<0.000000e+00> : vector<2x128xf32>
    %217 = tpu.matmul %215, %216, %cst_37 {dimension_numbers = #tpu.dot_dimension_numbers<[1], [0], [0], [1], [0, 0, 1, 1], [], []>} : vector<2x128xf32>, vector<128x128xf32>, vector<2x128xf32> -> vector<2x128xf32>
    %c0_38 = arith.constant 0 : index
    %c0_39 = arith.constant 0 : index
    %218 = vector.load %arg8[%c0_38, %c0_39] : memref<1x128xf32, #tpu.memory_space<vmem>>, vector<1x128xf32>
    %219 = vector.broadcast %218 : vector<1x128xf32> to vector<2x128xf32>
    %220 = arith.addf %217, %219 : vector<2x128xf32>
    %c0_40 = arith.constant 0 : index
    %c0_41 = arith.constant 0 : index
    %221 = vector.load %arg9[%c0_40, %c0_41] : memref<2x128xf32, #tpu.memory_space<vmem>>, vector<2x128xf32>
    tpu.vector_store %arg9[%c0_40, %c0_41], %220 {strides = array<i32>} : memref<2x128xf32, #tpu.memory_space<vmem>>, vector<2x128xf32>,
    return
  }
  func.func @transform_0(%arg0: i32) -> (i32, i32, i32) {
    %c0_i32 = arith.constant 0 : i32
    %c0_i32_0 = arith.constant 0 : i32
    %c0_i32_1 = arith.constant 0 : i32
    return %arg0, %c0_i32, %c0_i32_0 : i32, i32, i32
  }
  func.func @transform_1(%arg0: i32) -> (i32, i32) {
    %c0_i32 = arith.constant 0 : i32
    %c0_i32_0 = arith.constant 0 : i32
    %c0_i32_1 = arith.constant 0 : i32
    return %c0_i32, %c0_i32_0 : i32, i32
  }
  func.func @transform_2(%arg0: i32) -> (i32, i32) {
    %c0_i32 = arith.constant 0 : i32
    %c0_i32_0 = arith.constant 0 : i32
    %c0_i32_1 = arith.constant 0 : i32
    return %c0_i32, %c0_i32_0 : i32, i32
  }
  func.func @transform_3(%arg0: i32) -> (i32, i32) {
    %c0_i32 = arith.constant 0 : i32
    %c0_i32_0 = arith.constant 0 : i32
    %c0_i32_1 = arith.constant 0 : i32
    return %c0_i32, %c0_i32_0 : i32, i32
  }
  func.func @transform_4(%arg0: i32) -> (i32, i32) {
    %c0_i32 = arith.constant 0 : i32
    %c0_i32_0 = arith.constant 0 : i32
    %c0_i32_1 = arith.constant 0 : i32
    return %c0_i32, %c0_i32_0 : i32, i32
  }
  func.func @transform_5(%arg0: i32) -> (i32, i32) {
    %c0_i32 = arith.constant 0 : i32
    %c0_i32_0 = arith.constant 0 : i32
    %c0_i32_1 = arith.constant 0 : i32
    return %c0_i32, %c0_i32_0 : i32, i32
  }
  func.func @transform_6(%arg0: i32) -> (i32, i32) {
    %c0_i32 = arith.constant 0 : i32
    %c0_i32_0 = arith.constant 0 : i32
    %c0_i32_1 = arith.constant 0 : i32
    return %c0_i32, %c0_i32_0 : i32, i32
  }
  func.func @transform_7(%arg0: i32) -> (i32, i32) {
    %c0_i32 = arith.constant 0 : i32
    %c0_i32_0 = arith.constant 0 : i32
    %c0_i32_1 = arith.constant 0 : i32
    return %c0_i32, %c0_i32_0 : i32, i32
  }
  func.func @transform_8(%arg0: i32) -> (i32, i32) {
    %c0_i32 = arith.constant 0 : i32
    %c0_i32_0 = arith.constant 0 : i32
    return %arg0, %c0_i32 : i32, i32
  }
}

</mosaic_0001>

<bundles_post_ra>
// kernel: siamese_forward.1
= control target key start
LH: loop header
LB: loop body
LE: loop exit
PB: predicated region body
PF: predicated region fallthrough
CT: control target
= control target key end

     0   :  { %13 = vsyncpa [#allocation3], 0  ;;  %s2278_s0 = inlined_call_operand.vmem [shape: f32[1,64,64], index: 0, kind: input, shape index: {}]   ;;  %s2279_s1 = inlined_call_operand.vmem [shape: f32[64,256], index: 1, kind: input, shape index: {}]   ;;  %s2280_s2 = inlined_call_operand.vmem [shape: f32[1,256], index: 2, kind: input, shape index: {}]   ;;  %s2281_s3 = inlined_call_operand.hbm [shape: f32[64,256], index: 3, kind: input, shape index: {}]   ;;  %s2282_s4 = inlined_call_operand.vmem [shape: f32[64,128], index: 4, kind: input, shape index: {}]   ;;  %s2283_s5 = inlined_call_operand.vmem [shape: f32[1,128], index: 5, kind: input, shape index: {}]   ;;  %s2284_s6 = inlined_call_operand.hbm [shape: f32[128,128], index: 6, kind: input, shape index: {}]   ;;  %s2285_s7 = inlined_call_operand.vmem [shape: f32[1,128], index: 7, kind: input, shape index: {}]   ;;  %s2286_s8 = inlined_call_operand.hbm [shape: f32[2,128], index: 8, kind: output, shape index: {}]  }
   0x1   :  { %14 = vsyncpa [#allocation6], 0 }
   0x2   :  { %15 = vsyncpa [#allocation4], 0  ;;  %s1774_s27 = smov [#allocation2]   ;;  %s1702_s9 = scalar_lea.hbm %s2281_s3, 2048 }
   0x3   :  { %s27_s28 = sshll.u32 %s1774_s27, 4  ;;  %p1703_p0 = scmp.ne.s32.totalorder %s2281_s3, %s1702_s9  ;;  %s28_s28 = int_to_ptr.vmem [resolvable:$true] %s27_s28 }
   0x4   :  { %p1706_p1 = scmp.lt.u32.totalorder %s1702_s9, %s2281_s3 }
   0x6   :  { %p1708_p2 = pnand %p1706_p1, %p1703_p0 }
   0x8   :  { %1711 = shalt.err (!%p1708_p2)
}
   0x9   :  { %s1712_s14 = scalar_lea.vmem %s28_s28, 2048  ;;  %p1717_p4 = scmp.lt.s32.totalorder %s28_s28, %s28_s28 }
   0xa   :  { %p1713_p3 = scmp.ne.s32.totalorder %s28_s28, %s1712_s14  ;;  %p1718_p5 = scmp.lt.s32.totalorder %s1712_s14, %s1712_s14 }
   0xc   :  { %p1719_p6 = por %p1718_p5, %p1717_p4 }
   0xe   :  { %p1720_p7 = pnand %p1719_p6, %p1713_p3 }
  0x10   :  { %1723 = shalt.err (!%p1720_p7)
}
  0x11   :  { %s1775_s15 = smov 256   ;;  %s1776_s16 = smov 16  }
  0x12   :  { %33 = dma.hbm_to_vmem [thread:$0]  %s2281_s3, 2048, %s28_s28, [#allocation3], %s1775_s15, %s1775_s15, %s1776_s16  }
  0x13   :  { %s1777_s19 = smov [#allocation5]   ;;  %s1724_s23 = scalar_lea.hbm %s2284_s6, 2048 }
  0x14   :  { %s43_s20 = sshll.u32 %s1777_s19, 4  ;;  %p1725_p8 = scmp.ne.s32.totalorder %s2284_s6, %s1724_s23  ;;  %s44_s20 = int_to_ptr.vmem [resolvable:$true] %s43_s20 }
  0x15   :  { %p1728_p9 = scmp.lt.u32.totalorder %s1724_s23, %s2284_s6 }
  0x17   :  { %p1730_p10 = pnand %p1728_p9, %p1725_p8 }
  0x19   :  { %1733 = shalt.err (!%p1730_p10)
}
  0x1a   :  { %s1734_s29 = scalar_lea.vmem %s44_s20, 2048  ;;  %p1739_p12 = scmp.lt.s32.totalorder %s44_s20, %s44_s20 }
  0x1b   :  { %p1735_p11 = scmp.ne.s32.totalorder %s44_s20, %s1734_s29  ;;  %p1740_p13 = scmp.lt.s32.totalorder %s1734_s29, %s1734_s29 }
  0x1d   :  { %p1741_p0 = por %p1740_p13, %p1739_p12 }
  0x1f   :  { %p1742_p1 = pnand %p1741_p0, %p1735_p11 }
  0x21   :  { %1745 = shalt.err (!%p1742_p1)
}
  0x22   :  { %s1778_s3 = smov 128   ;;  %s1779_s28 = smov 8  }
  0x23   :  { %49 = dma.hbm_to_vmem [thread:$0]  %s2284_s6, 2048, %s44_s20, [#allocation6], %s1778_s3, %s1778_s3, %s1779_s28  }
  0x24   :  { %1768 = dma.done.wait [#allocation3], 2048  }
  0x25   :  { %1769 = vsyncadd [#allocation3], 4294965248 }
  0x26   :  { %1770 = dma.done.wait [#allocation6], 2048  }
  0x27   :  { %1771 = vsyncadd [#allocation6], 4294965248  ;;  %v1780_v0 = vmov 0.0   ;;  %v59_v1 = vld [vmem:[%s2279_s1 + $0x8] sm:$0xff]  ;;  %v61_v2 = vld [vmem:[%s2279_s1 + $0x18] sm:$0xff]  ;;  %vm110_vm0 = vcmask 523264   ;;  %v100_v57 = vlaneseq }
  0x28   :  { %199 = vmatprep.mubr.f32.mxu0 %v1780_v0  ;;  %364 = vmatprep.mubr.f32.mxu1 %v1780_v0  ;;  %v58_v3 = vld [vmem:[%s2279_s1] sm:$0xff]  ;;  %v1415_v4 = vpack.c.bf16 %v61_v2, %v59_v1  ;;  %v60_v5 = vld [vmem:[%s2279_s1 + $0x10] sm:$0xff]  ;;  %v63_v6 = vld [vmem:[%s2279_s1 + $0x28] sm:$0xff]  ;;  %vm1783_vm3 = vmmov 0   ;;  %s1784_s27 = smov [#allocation7]  }
  0x29   :  { %v65_v7 = vld [vmem:[%s2279_s1 + $0x38] sm:$0xff]  ;;  %v1417_v8 = vpack.c.bf16 %v60_v5, %v58_v3  ;;  %v62_v10 = vld [vmem:[%s2279_s1 + $0x20] sm:$0xff]  ;;  %v64_v11 = vld [vmem:[%s2279_s1 + $0x30] sm:$0xff]  ;;  %v101_v58 = vshrl.u32 %v100_v57, 7  ;;  %s1291_s29 = sshll.u32 %s1784_s27, 4  ;;  %s1292_s29 = int_to_ptr.vmem [resolvable:$true] %s1291_s29 }
  0x2a   :  { %v1419_v9 = vpack.c.bf16 %v65_v7, %v63_v6  ;;  %v67_v12 = vld [vmem:[%s2279_s1 + $0x48] sm:$0xff]  ;;  %1416 = vmatprep.subr.bf16.mxu0 %v1415_v4  ;;  %v69_v13 = vld [vmem:[%s2279_s1 + $0x58] sm:$0xff]  ;;  %v1421_v14 = vpack.c.bf16 %v64_v11, %v62_v10  ;;  %v66_v16 = vld [vmem:[%s2279_s1 + $0x40] sm:$0xff]  ;;  %v249_v6 = vand.u32 127, %v100_v57  ;;  %s1746_s3 = scalar_lea.vmem %s1292_s29, 32  ;;  %p1751_p3 = scmp.lt.s32.totalorder %s1292_s29, %s1292_s29 }
  0x2b   :  { %1418 = vmatpush1.bf16.msra.mxu0 %v1417_v8  ;;  %v1423_v15 = vpack.c.bf16 %v69_v13, %v67_v12  ;;  %v68_v17 = vld [vmem:[%s2279_s1 + $0x50] sm:$0xff]  ;;  %v71_v18 = vld [vmem:[%s2279_s1 + $0x68] sm:$0xff]  ;;  %v73_v19 = vld [vmem:[%s2279_s1 + $0x78] sm:$0xff]  ;;  %v102_v59 = vsub.s32 0, %v101_v58  ;;  %v106_v62 = vsub.s32 1, %v101_v58  ;;  %p1747_p2 = scmp.ne.s32.totalorder %s1292_s29, %s1746_s3  ;;  %p1752_p4 = scmp.lt.s32.totalorder %s1746_s3, %s1746_s3 }
  0x2c   :  { %1420 = vmatprep.subr.bf16.mxu0 %v1419_v9  ;;  %v76_v20 = vld [vmem:[#allocation2 + $0x8] sm:$0xff]  ;;  %v78_v21 = vld [vmem:[#allocation2 + $0x18] sm:$0xff]  ;;  %v75_v22 = vld [vmem:[#allocation2] sm:$0xff]  ;;  %v1425_v24 = vpack.c.bf16 %v68_v17, %v66_v16  ;;  %v1427_v30 = vpack.c.bf16 %v73_v19, %v71_v18  ;;  %v250_v13 = vadd.s32 128, %v249_v6  ;;  %v255_v16 = vand.u32 63, %v249_v6 }
  0x2d   :  { %v77_v23 = vld [vmem:[#allocation2 + $0x10] sm:$0xff]  ;;  %v70_v25 = vld [vmem:[%s2279_s1 + $0x60] sm:$0xff]  ;;  %v1901_v26 = vpack.c.bf16 %v78_v21, %v76_v20  ;;  %v80_v28 = vld [vmem:[#allocation2 + $0x28] sm:$0xff]  ;;  %p1753_p5 = por %p1752_p4, %p1751_p3 }
  0x2e   :  { %v1903_v27 = vpack.c.bf16 %v77_v23, %v75_v22  ;;  %v82_v29 = vld [vmem:[#allocation2 + $0x38] sm:$0xff]  ;;  %v72_v31 = vld [vmem:[%s2279_s1 + $0x70] sm:$0xff]  ;;  %v79_v33 = vld [vmem:[#allocation2 + $0x20] sm:$0xff]  ;;  %v262_v19 = vand.u32 63, %v250_v13  ;;  %vm2003_vm1 = vcmp.ge.s32.totalorder %v255_v16, 32 }
  0x2f   :  { %1422 = vmatpush1.bf16.msra.mxu0 %v1421_v14  ;;  %v1908_v32 = vpack.c.bf16 %v82_v29, %v80_v28  ;;  %v81_v34 = vld [vmem:[#allocation2 + $0x30] sm:$0xff]  ;;  %1432 = vmatprep.subr.bf16.mxu1 %v1901_v26  ;;  %v84_v35 = vld [vmem:[#allocation2 + $0x48] sm:$0xff]  ;;  %v86_v36 = vld [vmem:[#allocation2 + $0x58] sm:$0xff]  ;;  %v1429_v38 = vpack.c.bf16 %v72_v31, %v70_v25  ;;  %p1754_p6 = pnand %p1753_p5, %p1747_p2 }
  0x30   :  { %1424 = vmatprep.subr.bf16.mxu0 %v1423_v15  ;;  %1434 = vmatpush1.bf16.msra.mxu1 %v1903_v27  ;;  %v1912_v37 = vpack.c.bf16 %v81_v34, %v79_v33  ;;  %v1915_v39 = vpack.c.bf16 %v86_v36, %v84_v35  ;;  %v83_v40 = vld [vmem:[#allocation2 + $0x40] sm:$0xff]  ;;  %v85_v41 = vld [vmem:[#allocation2 + $0x50] sm:$0xff]  ;;  %v88_v42 = vld [vmem:[#allocation2 + $0x68] sm:$0xff]  ;;  %vm2009_vm2 = vcmp.ge.s32.totalorder %v262_v19, 32 }
  0x31   :  { %1436 = vmatprep.subr.bf16.mxu1 %v1908_v32  ;;  %v90_v43 = vld [vmem:[#allocation2 + $0x78] sm:$0xff]  ;;  %v1918_v44 = vpack.c.bf16 %v85_v41, %v83_v40  ;;  %v91_v45 = vld [vmem:[%s2278_s0] sm:$0xff]  ;;  %v89_v48 = vld [vmem:[#allocation2 + $0x70] sm:$0xff] }
  0x32   :  { %v1924_v46 = vpack.c.bf16 %v90_v43, %v88_v42  ;;  %v87_v47 = vld [vmem:[#allocation2 + $0x60] sm:$0xff]  ;;  %v92_v50 = vld [vmem:[%s2278_s0 + $0x8] sm:$0xff]  ;;  %v93_v51 = vld [vmem:[%s2278_s0 + $0x10] sm:$0xff] }
  0x33   :  { %1426 = vmatpush1.bf16.msra.mxu0 %v1425_v24  ;;  %v1929_v49 = vpack.c.bf16 %v89_v48, %v87_v47  ;;  %v94_v52 = vld [vmem:[%s2278_s0 + $0x18] sm:$0xff]  ;;  %v95_v53 = vld [vmem:[%s2278_s0 + $0x20] sm:$0xff]  ;;  %v96_v54 = vld [vmem:[%s2278_s0 + $0x28] sm:$0xff] }
  0x34   :  { %1428 = vmatprep.subr.bf16.mxu0 %v1427_v30  ;;  %1438 = vmatpush1.bf16.msra.mxu1 %v1912_v37  ;;  %v97_v55 = vld [vmem:[%s2278_s0 + $0x30] sm:$0xff]  ;;  %v98_v56 = vld [vmem:[%s2278_s0 + $0x38] sm:$0xff]  ;;  %v74_v60 = vld [vmem:[%s2280_s2] sm:$0x3]  ;;  %s1781_s0 = smov 64  }
  0x35   :  { %1440 = vmatprep.subr.bf16.mxu1 %v1915_v39  ;;  %v103_v1 = vrot.slane %v74_v60, %v102_v59  ;;  %v107_v2 = vrot.slane %v74_v60, %v106_v62  ;;  %v1101_v25 = vld [vmem:[%s2282_s4 + $0x8] sm:$0xff] }
  0x37   :  { %1430 = vmatpush1.bf16.msra.mxu0 %v1429_v38 }
  0x38   :  { %1464 = vmatprep.subr.bf16.mxu0 %v1901_v26  ;;  %1442 = vmatpush1.bf16.msra.mxu1 %v1918_v44 }
  0x39   :  { %1444 = vmatprep.subr.bf16.mxu1 %v1924_v46 }
  0x3a   :  { %1301 = vmatmul.mubr.msk.f32.vlgmr.msra.gmra.mrb[0].mxu0 %vm110_vm0, %v91_v45 }
  0x3b   :  { %205 = vmatprep.mubr.f32.mxu0 %v1780_v0  ;;  %1466 = vmatpush1.bf16.msra.mxu0 %v1903_v27 }
  0x3c   :  { %1468 = vmatprep.subr.bf16.mxu0 %v1908_v32  ;;  %1446 = vmatpush1.bf16.msra.mxu1 %v1929_v49 }
  0x3d   :  { %1448 = vmatprep.subr.bf16.mxu1 %v1901_v26 }
  0x3e   :  { %1302 = vmatmul.mubr.msk.f32.gmra.mrb[2].mxu0 %vm110_vm0, %v92_v50 }
  0x3f   :  { %211 = vmatprep.mubr.f32.mxu0 %v1780_v0  ;;  %1470 = vmatpush1.bf16.msra.mxu0 %v1912_v37 }
  0x40   :  { %365 = vmatmul.mubr.f32.vlgmr.msra.gmra.mrb[0].mxu1 %v1780_v0  ;;  %1472 = vmatprep.subr.bf16.mxu0 %v1915_v39 }
  0x41   :  { %1450 = vmatpush1.bf16.msra.mxu1 %v1903_v27  ;;  %464 = vmatprep.mubr.f32.mxu1 %v1780_v0 }
  0x42   :  { %1303 = vmatmul.mubr.msk.f32.gmra.mrb[4].mxu0 %vm110_vm0, %v93_v51  ;;  %1452 = vmatprep.subr.bf16.mxu1 %v1908_v32 }
  0x43   :  { %217 = vmatprep.mubr.f32.mxu0 %v1780_v0  ;;  %1474 = vmatpush1.bf16.msra.mxu0 %v1918_v44 }
  0x44   :  { %1476 = vmatprep.subr.bf16.mxu0 %v1924_v46 }
  0x45   :  { %1454 = vmatpush1.bf16.msra.mxu1 %v1912_v37 }
  0x46   :  { %1304 = vmatmul.mubr.msk.f32.gmra.mrb[6].mxu0 %vm110_vm0, %v94_v52  ;;  %1456 = vmatprep.subr.bf16.mxu1 %v1915_v39 }
  0x47   :  { %223 = vmatprep.mubr.f32.mxu0 %v1780_v0  ;;  %1478 = vmatpush1.bf16.msra.mxu0 %v1929_v49 }
  0x48   :  { %1496 = vmatprep.subr.bf16.mxu0 %v1901_v26 }
  0x49   :  { %1458 = vmatpush1.bf16.msra.mxu1 %v1918_v44 }
  0x4a   :  { %1305 = vmatmul.mubr.msk.f32.gmra.mrb[8].mxu0 %vm110_vm0, %v95_v53  ;;  %1460 = vmatprep.subr.bf16.mxu1 %v1924_v46 }
  0x4b   :  { %229 = vmatprep.mubr.f32.mxu0 %v1780_v0 }
  0x4d   :  { %1462 = vmatpush1.bf16.msra.mxu1 %v1929_v49 }
  0x4e   :  { %1306 = vmatmul.mubr.msk.f32.gmra.mrb[10].mxu0 %vm110_vm0, %v96_v54  ;;  %1480 = vmatprep.subr.bf16.mxu1 %v1901_v26 }
  0x4f   :  { %235 = vmatprep.mubr.f32.mxu0 %v1780_v0 }
  0x52   :  { %1307 = vmatmul.mubr.msk.f32.gmra.mrb[12].mxu0 %vm110_vm0, %v97_v55 }
  0x53   :  { %241 = vmatprep.mubr.f32.mxu0 %v1780_v0 }
  0x56   :  { %1308 = vmatmul.mubr.msk.f32.gmra.mrb[14].mxu0 %vm110_vm0, %v98_v56 }
  0x57   :  { %564 = vmatprep.mubr.f32.mxu0 %v1780_v0 }
 0x10d   :  { %v201_v61 = vpop.f32.mrb[0].mxu0 }
 0x10e   :  { %v203_v63 = vpop.f32.mrb[1].mxu0  ;;  %v2071_v56 = vadd.f32 %v201_v61, %v103_v1 }
 0x10f   :  { %v2075_v59 = vadd.f32 %v203_v63, %v107_v2 }
 0x111   :  { %v207_v3 = vpop.f32.mrb[2].mxu0 }
 0x112   :  { %v1991_v4 = vadd.f32 %v207_v3, %v103_v1  ;;  %v209_v5 = vpop.f32.mrb[3].mxu0 }
 0x113   :  { %v1993_v7 = vadd.f32 %v209_v5, %v107_v2  ;;  %v366_v8 = vpop.f32.mrb[0].mxu1 }
 0x114   :  { %v368_v10 = vpop.f32.mrb[1].mxu1 }
 0x115   :  { %v213_v9 = vpop.f32.mrb[4].mxu0 }
 0x116   :  { %v1995_v11 = vadd.f32 %v213_v9, %v103_v1  ;;  %v215_v12 = vpop.f32.mrb[5].mxu0 }
 0x117   :  { %v1997_v14 = vadd.f32 %v215_v12, %v107_v2 }
 0x119   :  { %v219_v15 = vpop.f32.mrb[6].mxu0 }
 0x11a   :  { %v1999_v17 = vadd.f32 %v219_v15, %v103_v1  ;;  %v221_v18 = vpop.f32.mrb[7].mxu0 }
 0x11b   :  { %v2001_v20 = vadd.f32 %v221_v18, %v107_v2 }
 0x11d   :  { %v225_v21 = vpop.f32.mrb[8].mxu0 }
 0x11e   :  { %v2007_v23 = vadd.f32 %v225_v21, %v103_v1  ;;  %v227_v24 = vpop.f32.mrb[9].mxu0 }
 0x11f   :  { %v2013_v28 = vadd.f32 %v227_v24, %v107_v2 }
 0x120   :  { %v287_v29 = vsel %vm2003_vm1, %v2007_v23, %v1999_v17  ;;  %v289_v30 = vsel %vm2003_vm1, %v1999_v17, %v2007_v23 }
 0x121   :  { %v231_v31 = vpop.f32.mrb[10].mxu0  ;;  %v288_v33 = vsel %vm2009_vm2, %v2013_v28, %v2001_v20  ;;  %v290_v34 = vsel %vm2009_vm2, %v2001_v20, %v2013_v28 }
 0x122   :  { %v2031_v35 = vadd.f32 %v231_v31, %v103_v1  ;;  %v233_v36 = vpop.f32.mrb[11].mxu0 }
 0x123   :  { %v2033_v38 = vadd.f32 %v233_v36, %v107_v2 }
 0x124   :  { %v285_v40 = vsel %vm2003_vm1, %v2031_v35, %v1995_v11  ;;  %v291_v41 = vsel %vm2003_vm1, %v1995_v11, %v2031_v35 }
 0x125   :  { %v237_v42 = vpop.f32.mrb[12].mxu0  ;;  %v286_v43 = vsel %vm2009_vm2, %v2033_v38, %v1997_v14  ;;  %v292_v45 = vsel %vm2009_vm2, %v1997_v14, %v2033_v38 }
 0x126   :  { %v2051_v47 = vadd.f32 %v237_v42, %v103_v1  ;;  %v239_v48 = vpop.f32.mrb[13].mxu0 }
 0x127   :  { %v2053_v50 = vadd.f32 %v239_v48, %v107_v2 }
 0x128   :  { %v283_v51 = vsel %vm2003_vm1, %v2051_v47, %v1991_v4  ;;  %v293_v52 = vsel %vm2003_vm1, %v1991_v4, %v2051_v47 }
 0x129   :  { %v243_v53 = vpop.f32.mrb[14].mxu0  ;;  %v284_v54 = vsel %vm2009_vm2, %v2053_v50, %v1993_v7  ;;  %v294_v55 = vsel %vm2009_vm2, %v1993_v7, %v2053_v50 }
 0x12a   :  { %v2073_v57 = vadd.f32 %v243_v53, %v103_v1  ;;  %v245_v58 = vpop.f32.mrb[15].mxu0 }
 0x12b   :  { %v2077_v60 = vadd.f32 %v245_v58, %v107_v2 }
 0x12c   :  { %v281_v62 = vsel %vm2003_vm1, %v2073_v57, %v2071_v56  ;;  %v295_v3 = vsel %vm2003_vm1, %v2071_v56, %v2073_v57  ;;  %v1100_v56 = vld [vmem:[%s2282_s4] sm:$0xff]  ;;  %v1102_v57 = vld [vmem:[%s2282_s4 + $0x10] sm:$0xff] }
 0x12d   :  { %v371_v5 = vadd.f32 %v366_v8, %v281_v62  ;;  %v282_v61 = vsel %vm2009_vm2, %v2077_v60, %v2075_v59  ;;  %v296_v63 = vsel %vm2009_vm2, %v2075_v59, %v2077_v60  ;;  %v1782_v59 = vmov 0.0|0.0  }
 0x12e   :  { %v372_v1 = vadd.f32 %v368_v10, %v282_v61  ;;  %v1560_v60 = vpack.c.bf16 %v1101_v25, %v1100_v56 }
 0x12f   :  { %v1309_v2 = vmul.f32 -1.442695, %v371_v5 }
 0x130   :  { %v1310_v15 = vmul.f32 -1.442695, %v372_v1 }
 0x131   :  { %1606 = vpow2.f32 %v1309_v2 }
 0x132   :  { %1608 = vtanh.f32 %v372_v1 }
 0x13b   :  { %v1607_v6 = vpop.eup %1606 }
 0x13c   :  { %v379_v9 = vadd.f32 1.0, %v1607_v6  ;;  %v1609_v12 = vpop.eup %1608 }
 0x13e   :  { %1610 = vrcp.f32 %v379_v9 }
 0x13f   :  { %1612 = vpow2.f32 %v1310_v15 }
 0x148   :  { %v1611_v13 = vpop.eup %1610 }
 0x149   :  { %v387_v8 = vmul.f32 %v1611_v13, %v1609_v12  ;;  %v1613_v16 = vpop.eup %1612  ;;  %v386_v19 = vmul.f32 0.0, %v1611_v13 }
 0x14a   :  { %v380_v18 = vadd.f32 1.0, %v1613_v16 }
 0x14b   :  { %389 = vrot.lane.b32.xlu0 %v387_v8, %s1781_s0 }
 0x14c   :  { %1614 = vrcp.f32 %v380_v18 }
 0x156   :  { %v1615_v10 = vpop.eup %1614 }
 0x1bd   :  { %v390_v21 = vpop.permute.xlu0 %389 }
 0x1be   :  { %v392_v24 = vadd.f32 %v390_v21, %v386_v19 }
 0x1c0   :  { %1616 = vtanh.f32 %v392_v24 }
 0x1ca   :  { %v1617_v31 = vpop.eup %1616 }
 0x1cb   :  { %v394_v36 = vmul.f32 %v1617_v31, %v1615_v10 }
 0x1cd   :  { %396 = vrot.lane.b32.xlu0 %v394_v36, %s1781_s0 }
 0x23f   :  { %v397_v42 = vpop.permute.xlu0 %396 }
 0x240   :  { %1311 = vmatmul.mubr.msk.f32.vlgmr.msra.gmra.mrb[2].mxu1 %vm110_vm0, %v397_v42 }
 0x241   :  { %1482 = vmatpush1.bf16.msra.mxu1 %v1903_v27  ;;  %664 = vmatprep.mubr.f32.mxu1 %v1780_v0 }
 0x242   :  { %1484 = vmatprep.subr.bf16.mxu1 %v1908_v32 }
 0x245   :  { %1486 = vmatpush1.bf16.msra.mxu1 %v1912_v37 }
 0x246   :  { %1488 = vmatprep.subr.bf16.mxu1 %v1915_v39 }
 0x249   :  { %1490 = vmatpush1.bf16.msra.mxu1 %v1918_v44 }
 0x24a   :  { %1492 = vmatprep.subr.bf16.mxu1 %v1924_v46 }
 0x24d   :  { %1494 = vmatpush1.bf16.msra.mxu1 %v1929_v49 }
 0x24e   :  { %1512 = vmatprep.subr.bf16.mxu1 %v1901_v26 }
 0x313   :  { %v466_v48 = vpop.f32.mrb[2].mxu1 }
 0x314   :  { %v471_v53 = vadd.f32 %v466_v48, %v283_v51  ;;  %v468_v58 = vpop.f32.mrb[3].mxu1 }
 0x315   :  { %v472_v62 = vadd.f32 %v468_v58, %v284_v54 }
 0x316   :  { %v1312_v5 = vmul.f32 -1.442695, %v471_v53 }
 0x317   :  { %v1313_v12 = vmul.f32 -1.442695, %v472_v62 }
 0x318   :  { %1618 = vpow2.f32 %v1312_v5 }
 0x319   :  { %1620 = vtanh.f32 %v472_v62 }
 0x322   :  { %v1619_v61 = vpop.eup %1618 }
 0x323   :  { %v479_v1 = vadd.f32 1.0, %v1619_v61  ;;  %v1621_v2 = vpop.eup %1620 }
 0x325   :  { %1622 = vrcp.f32 %v479_v1 }
 0x326   :  { %1624 = vpow2.f32 %v1313_v12 }
 0x32f   :  { %v1623_v6 = vpop.eup %1622 }
 0x330   :  { %v487_v9 = vmul.f32 %v1623_v6, %v1621_v2  ;;  %v1625_v13 = vpop.eup %1624  ;;  %v486_v15 = vmul.f32 %v1623_v6, %v392_v24 }
 0x331   :  { %v480_v8 = vadd.f32 1.0, %v1625_v13 }
 0x332   :  { %489 = vrot.lane.b32.xlu1 %v487_v9, %s1781_s0 }
 0x333   :  { %1626 = vrcp.f32 %v480_v8 }
 0x33d   :  { %v1627_v54 = vpop.eup %1626 }
 0x3a4   :  { %v490_v16 = vpop.permute.xlu1 %489 }
 0x3a5   :  { %v492_v51 = vadd.f32 %v490_v16, %v486_v15 }
 0x3a7   :  { %1628 = vtanh.f32 %v492_v51 }
 0x3b1   :  { %v1629_v18 = vpop.eup %1628 }
 0x3b2   :  { %v494_v19 = vmul.f32 %v1629_v18, %v1627_v54 }
 0x3b4   :  { %496 = vrot.lane.b32.xlu1 %v494_v19, %s1781_s0 }
 0x426   :  { %v497_v21 = vpop.permute.xlu1 %496 }
 0x427   :  { %1314 = vmatmul.mubr.msk.f32.vlgmr.msra.gmra.mrb[16].mxu0 %vm110_vm0, %v497_v21 }
 0x428   :  { %1498 = vmatpush1.bf16.msra.mxu0 %v1903_v27  ;;  %764 = vmatprep.mubr.f32.mxu0 %v1780_v0 }
 0x429   :  { %1500 = vmatprep.subr.bf16.mxu0 %v1908_v32 }
 0x42c   :  { %1502 = vmatpush1.bf16.msra.mxu0 %v1912_v37 }
 0x42d   :  { %1504 = vmatprep.subr.bf16.mxu0 %v1915_v39 }
 0x430   :  { %1506 = vmatpush1.bf16.msra.mxu0 %v1918_v44 }
 0x431   :  { %1508 = vmatprep.subr.bf16.mxu0 %v1924_v46 }
 0x434   :  { %1510 = vmatpush1.bf16.msra.mxu0 %v1929_v49 }
 0x435   :  { %1528 = vmatprep.subr.bf16.mxu0 %v1901_v26 }
 0x4fa   :  { %v566_v24 = vpop.f32.mrb[16].mxu0 }
 0x4fb   :  { %v571_v10 = vadd.f32 %v566_v24, %v285_v40  ;;  %v568_v31 = vpop.f32.mrb[17].mxu0 }
 0x4fc   :  { %v572_v36 = vadd.f32 %v568_v31, %v286_v43 }
 0x4fd   :  { %v1315_v42 = vmul.f32 -1.442695, %v571_v10 }
 0x4fe   :  { %v1316_v61 = vmul.f32 -1.442695, %v572_v36 }
 0x4ff   :  { %1630 = vpow2.f32 %v1315_v42 }
 0x500   :  { %1632 = vtanh.f32 %v572_v36 }
 0x509   :  { %v1631_v48 = vpop.eup %1630 }
 0x50a   :  { %v579_v53 = vadd.f32 1.0, %v1631_v48  ;;  %v1633_v58 = vpop.eup %1632 }
 0x50c   :  { %1634 = vrcp.f32 %v579_v53 }
 0x50d   :  { %1636 = vpow2.f32 %v1316_v61 }
 0x516   :  { %v1635_v62 = vpop.eup %1634 }
 0x517   :  { %v587_v5 = vmul.f32 %v1635_v62, %v1633_v58  ;;  %v1637_v40 = vpop.eup %1636  ;;  %v586_v2 = vmul.f32 %v1635_v62, %v492_v51 }
 0x518   :  { %v580_v1 = vadd.f32 1.0, %v1637_v40 }
 0x519   :  { %589 = vrot.lane.b32.xlu0 %v587_v5, %s1781_s0 }
 0x51a   :  { %1638 = vrcp.f32 %v580_v1 }
 0x524   :  { %v1639_v43 = vpop.eup %1638 }
 0x58b   :  { %v590_v6 = vpop.permute.xlu0 %589 }
 0x58c   :  { %v592_v9 = vadd.f32 %v590_v6, %v586_v2 }
 0x58e   :  { %1640 = vtanh.f32 %v592_v9 }
 0x598   :  { %v1641_v12 = vpop.eup %1640 }
 0x599   :  { %v594_v13 = vmul.f32 %v1641_v12, %v1639_v43 }
 0x59b   :  { %596 = vrot.lane.b32.xlu1 %v594_v13, %s1781_s0 }
 0x60d   :  { %v597_v8 = vpop.permute.xlu1 %596 }
 0x60e   :  { %1317 = vmatmul.mubr.msk.f32.vlgmr.msra.gmra.mrb[4].mxu1 %vm110_vm0, %v597_v8 }
 0x60f   :  { %1514 = vmatpush1.bf16.msra.mxu1 %v1903_v27  ;;  %864 = vmatprep.mubr.f32.mxu1 %v1780_v0 }
 0x610   :  { %1516 = vmatprep.subr.bf16.mxu1 %v1908_v32 }
 0x613   :  { %1518 = vmatpush1.bf16.msra.mxu1 %v1912_v37 }
 0x614   :  { %1520 = vmatprep.subr.bf16.mxu1 %v1915_v39 }
 0x617   :  { %1522 = vmatpush1.bf16.msra.mxu1 %v1918_v44 }
 0x618   :  { %1524 = vmatprep.subr.bf16.mxu1 %v1924_v46 }
 0x61b   :  { %1526 = vmatpush1.bf16.msra.mxu1 %v1929_v49 }
 0x61c   :  { %1544 = vmatprep.subr.bf16.mxu1 %v1901_v26 }
 0x6e1   :  { %v666_v15 = vpop.f32.mrb[4].mxu1 }
 0x6e2   :  { %v671_v16 = vadd.f32 %v666_v15, %v287_v29  ;;  %v668_v51 = vpop.f32.mrb[5].mxu1 }
 0x6e3   :  { %v672_v54 = vadd.f32 %v668_v51, %v288_v33 }
 0x6e4   :  { %v1318_v18 = vmul.f32 -1.442695, %v671_v16 }
 0x6e5   :  { %v1319_v31 = vmul.f32 -1.442695, %v672_v54 }
 0x6e6   :  { %1642 = vpow2.f32 %v1318_v18 }
 0x6e7   :  { %1644 = vtanh.f32 %v672_v54 }
 0x6f0   :  { %v1643_v19 = vpop.eup %1642 }
 0x6f1   :  { %v679_v21 = vadd.f32 1.0, %v1643_v19  ;;  %v1645_v26 = vpop.eup %1644 }
 0x6f3   :  { %1646 = vrcp.f32 %v679_v21 }
 0x6f4   :  { %1648 = vpow2.f32 %v1319_v31 }
 0x6fd   :  { %v1647_v24 = vpop.eup %1646 }
 0x6fe   :  { %v687_v10 = vmul.f32 %v1647_v24, %v1645_v26  ;;  %v1649_v29 = vpop.eup %1648  ;;  %v686_v42 = vmul.f32 %v1647_v24, %v592_v9 }
 0x6ff   :  { %v680_v36 = vadd.f32 1.0, %v1649_v29 }
 0x700   :  { %689 = vrot.lane.b32.xlu0 %v687_v10, %s1781_s0 }
 0x701   :  { %1650 = vrcp.f32 %v680_v36 }
 0x70b   :  { %v1651_v33 = vpop.eup %1650 }
 0x772   :  { %v690_v48 = vpop.permute.xlu0 %689 }
 0x773   :  { %v692_v53 = vadd.f32 %v690_v48, %v686_v42 }
 0x775   :  { %1652 = vtanh.f32 %v692_v53 }
 0x77f   :  { %v1653_v58 = vpop.eup %1652 }
 0x780   :  { %v694_v62 = vmul.f32 %v1653_v58, %v1651_v33 }
 0x782   :  { %696 = vrot.lane.b32.xlu1 %v694_v62, %s1781_s0 }
 0x7f4   :  { %v697_v5 = vpop.permute.xlu1 %696 }
 0x7f5   :  { %1320 = vmatmul.mubr.msk.f32.vlgmr.msra.gmra.mrb[18].mxu0 %vm110_vm0, %v697_v5 }
 0x7f6   :  { %1530 = vmatpush1.bf16.msra.mxu0 %v1903_v27  ;;  %964 = vmatprep.mubr.f32.mxu0 %v1780_v0 }
 0x7f7   :  { %1532 = vmatprep.subr.bf16.mxu0 %v1908_v32 }
 0x7fa   :  { %1534 = vmatpush1.bf16.msra.mxu0 %v1912_v37 }
 0x7fb   :  { %1536 = vmatprep.subr.bf16.mxu0 %v1915_v39 }
 0x7fe   :  { %1538 = vmatpush1.bf16.msra.mxu0 %v1918_v44 }
 0x7ff   :  { %1540 = vmatprep.subr.bf16.mxu0 %v1924_v46 }
 0x802   :  { %1542 = vmatpush1.bf16.msra.mxu0 %v1929_v49 }
 0x803   :  { %1559 = vmatprep.subr.bf16.mxu0 %v1782_v59 }
 0x8c8   :  { %v766_v61 = vpop.f32.mrb[18].mxu0 }
 0x8c9   :  { %v771_v40 = vadd.f32 %v766_v61, %v289_v30  ;;  %v768_v1 = vpop.f32.mrb[19].mxu0 }
 0x8ca   :  { %v772_v2 = vadd.f32 %v768_v1, %v290_v34 }
 0x8cb   :  { %v1321_v6 = vmul.f32 -1.442695, %v771_v40 }
 0x8cc   :  { %v1322_v17 = vmul.f32 -1.442695, %v772_v2 }
 0x8cd   :  { %1654 = vpow2.f32 %v1321_v6 }
 0x8ce   :  { %1656 = vtanh.f32 %v772_v2 }
 0x8d7   :  { %v1655_v9 = vpop.eup %1654 }
 0x8d8   :  { %v779_v43 = vadd.f32 1.0, %v1655_v9  ;;  %v1657_v12 = vpop.eup %1656 }
 0x8da   :  { %1658 = vrcp.f32 %v779_v43 }
 0x8db   :  { %1660 = vpow2.f32 %v1322_v17 }
 0x8e4   :  { %v1659_v13 = vpop.eup %1658 }
 0x8e5   :  { %v787_v8 = vmul.f32 %v1659_v13, %v1657_v12  ;;  %v1661_v23 = vpop.eup %1660  ;;  %v786_v15 = vmul.f32 %v1659_v13, %v692_v53 }
 0x8e6   :  { %v780_v30 = vadd.f32 1.0, %v1661_v23 }
 0x8e7   :  { %789 = vrot.lane.b32.xlu0 %v787_v8, %s1781_s0 }
 0x8e8   :  { %1662 = vrcp.f32 %v780_v30 }
 0x8f2   :  { %v1663_v20 = vpop.eup %1662 }
 0x959   :  { %v790_v16 = vpop.permute.xlu0 %789 }
 0x95a   :  { %v792_v51 = vadd.f32 %v790_v16, %v786_v15  ;;  %v1104_v16 = vld [vmem:[%s2282_s4 + $0x20] sm:$0xff] }
 0x95c   :  { %1664 = vtanh.f32 %v792_v51 }
 0x966   :  { %v1665_v28 = vpop.eup %1664 }
 0x967   :  { %v794_v34 = vmul.f32 %v1665_v28, %v1663_v20  ;;  %v1107_v28 = vld [vmem:[%s2282_s4 + $0x38] sm:$0xff] }
 0x969   :  { %796 = vrot.lane.b32.xlu1 %v794_v34, %s1781_s0 }
 0x9db   :  { %v797_v54 = vpop.permute.xlu1 %796 }
 0x9dc   :  { %1323 = vmatmul.mubr.msk.f32.vlgmr.msra.gmra.mrb[6].mxu1 %vm110_vm0, %v797_v54 }
 0x9dd   :  { %1546 = vmatpush1.bf16.msra.mxu1 %v1903_v27  ;;  %1064 = vmatprep.mubr.f32.mxu1 %v1780_v0 }
 0x9de   :  { %1548 = vmatprep.subr.bf16.mxu1 %v1908_v32 }
 0x9e1   :  { %1550 = vmatpush1.bf16.msra.mxu1 %v1912_v37 }
 0x9e2   :  { %1552 = vmatprep.subr.bf16.mxu1 %v1915_v39 }
 0x9e5   :  { %1554 = vmatpush1.bf16.msra.mxu1 %v1918_v44 }
 0x9e6   :  { %1556 = vmatprep.subr.bf16.mxu1 %v1924_v46 }
 0x9e9   :  { %1558 = vmatpush1.bf16.msra.mxu1 %v1929_v49 }
 0x9ea   :  { %1571 = vmatprep.subr.bf16.mxu1 %v1782_v59 }
 0xaaf   :  { %v866_v18 = vpop.f32.mrb[6].mxu1 }
 0xab0   :  { %v871_v27 = vadd.f32 %v866_v18, %v291_v41  ;;  %v868_v19 = vpop.f32.mrb[7].mxu1 }
 0xab1   :  { %v872_v32 = vadd.f32 %v868_v19, %v292_v45 }
 0xab2   :  { %v1324_v37 = vmul.f32 -1.442695, %v871_v27 }
 0xab3   :  { %v1325_v11 = vmul.f32 -1.442695, %v872_v32 }
 0xab4   :  { %1666 = vpow2.f32 %v1324_v37 }
 0xab5   :  { %1668 = vtanh.f32 %v872_v32 }
 0xabe   :  { %v1667_v39 = vpop.eup %1666 }
 0xabf   :  { %v879_v44 = vadd.f32 1.0, %v1667_v39  ;;  %v1669_v46 = vpop.eup %1668  ;;  %v1191_v39 = vld [vmem:[#allocation5] sm:$0xff] }
 0xac1   :  { %1670 = vrcp.f32 %v879_v44  ;;  %v1192_v44 = vld [vmem:[#allocation5 + $0x8] sm:$0xff] }
 0xac2   :  { %1672 = vpow2.f32 %v1325_v11 }
 0xacb   :  { %v1671_v49 = vpop.eup %1670 }
 0xacc   :  { %v887_v21 = vmul.f32 %v1671_v49, %v1669_v46  ;;  %v1673_v35 = vpop.eup %1672  ;;  %v886_v26 = vmul.f32 %v1671_v49, %v792_v51  ;;  %v1105_v51 = vld [vmem:[%s2282_s4 + $0x28] sm:$0xff]  ;;  %v1193_v46 = vld [vmem:[#allocation5 + $0x10] sm:$0xff]  ;;  %v1572_v49 = vpack.c.bf16 %v1192_v44, %v1191_v39 }
 0xacd   :  { %v880_v41 = vadd.f32 1.0, %v1673_v35  ;;  %v1566_v20 = vpack.c.bf16 %v1105_v51, %v1104_v16 }
 0xace   :  { %889 = vrot.lane.b32.xlu0 %v887_v21, %s1781_s0  ;;  %v1194_v21 = vld [vmem:[#allocation5 + $0x18] sm:$0xff] }
 0xacf   :  { %1674 = vrcp.f32 %v880_v41  ;;  %v1575_v35 = vpack.c.bf16 %v1194_v21, %v1193_v46 }
 0xad9   :  { %v1675_v14 = vpop.eup %1674 }
 0xb40   :  { %v890_v24 = vpop.permute.xlu0 %889 }
 0xb41   :  { %v892_v10 = vadd.f32 %v890_v24, %v886_v26  ;;  %v1195_v26 = vld [vmem:[#allocation5 + $0x20] sm:$0xff]  ;;  %v1196_v24 = vld [vmem:[#allocation5 + $0x28] sm:$0xff] }
 0xb43   :  { %1676 = vtanh.f32 %v892_v10 }
 0xb4d   :  { %v1677_v38 = vpop.eup %1676 }
 0xb4e   :  { %v894_v45 = vmul.f32 %v1677_v38, %v1675_v14  ;;  %v1578_v38 = vpack.c.bf16 %v1196_v24, %v1195_v26 }
 0xb50   :  { %896 = vrot.lane.b32.xlu1 %v894_v45, %s1781_s0  ;;  %v1197_v45 = vld [vmem:[#allocation5 + $0x30] sm:$0xff] }
 0xbc2   :  { %v897_v31 = vpop.permute.xlu1 %896 }
 0xbc3   :  { %1326 = vmatmul.mubr.msk.f32.vlgmr.msra.gmra.mrb[20].mxu0 %vm110_vm0, %v897_v31  ;;  %v1198_v31 = vld [vmem:[#allocation5 + $0x38] sm:$0xff] }
 0xbc4   :  { %1377 = vmatprep.mubr.msk.f32.mxu0 %vm1783_vm3, %v1780_v0  ;;  %1561 = vmatpush3.bf16.msra.mxu0 %v1560_v60 }
 0xbc5   :  { %1562 = vmatprep.subr.bf16.mxu0 %v1782_v59 }
 0xc96   :  { %v966_v29 = vpop.f32.mrb[20].mxu0 }
 0xc97   :  { %v971_v36 = vadd.f32 %v966_v29, %v293_v52  ;;  %v968_v42 = vpop.f32.mrb[21].mxu0 }
 0xc98   :  { %v972_v48 = vadd.f32 %v968_v42, %v294_v55  ;;  %v1581_v42 = vpack.c.bf16 %v1198_v31, %v1197_v45 }
 0xc99   :  { %v1327_v53 = vmul.f32 -1.442695, %v971_v36 }
 0xc9a   :  { %v1328_v4 = vmul.f32 -1.442695, %v972_v48 }
 0xc9b   :  { %1678 = vpow2.f32 %v1327_v53  ;;  %v1200_v53 = vld [vmem:[#allocation5 + $0x48] sm:$0xff] }
 0xc9c   :  { %1680 = vtanh.f32 %v972_v48  ;;  %v1199_v48 = vld [vmem:[#allocation5 + $0x40] sm:$0xff] }
 0xca5   :  { %v1679_v33 = vpop.eup %1678 }
 0xca6   :  { %v979_v58 = vadd.f32 1.0, %v1679_v33  ;;  %v1681_v62 = vpop.eup %1680  ;;  %v1584_v33 = vpack.c.bf16 %v1200_v53, %v1199_v48 }
 0xca8   :  { %1682 = vrcp.f32 %v979_v58  ;;  %v1201_v58 = vld [vmem:[#allocation5 + $0x50] sm:$0xff] }
 0xca9   :  { %1684 = vpow2.f32 %v1328_v4  ;;  %v1204_v4 = vld [vmem:[#allocation5 + $0x68] sm:$0xff] }
 0xcb2   :  { %v1683_v5 = vpop.eup %1682 }
 0xcb3   :  { %v987_v61 = vmul.f32 %v1683_v5, %v1681_v62  ;;  %v1685_v47 = vpop.eup %1684  ;;  %v986_v40 = vmul.f32 %v1683_v5, %v892_v10  ;;  %v1202_v62 = vld [vmem:[#allocation5 + $0x58] sm:$0xff] }
 0xcb4   :  { %v980_v52 = vadd.f32 1.0, %v1685_v47  ;;  %v1587_v5 = vpack.c.bf16 %v1202_v62, %v1201_v58 }
 0xcb5   :  { %989 = vrot.lane.b32.xlu0 %v987_v61, %s1781_s0  ;;  %v1203_v61 = vld [vmem:[#allocation5 + $0x60] sm:$0xff] }
 0xcb6   :  { %1686 = vrcp.f32 %v980_v52  ;;  %v1590_v47 = vpack.c.bf16 %v1204_v4, %v1203_v61 }
 0xcc0   :  { %v1687_v7 = vpop.eup %1686 }
 0xd27   :  { %v990_v1 = vpop.permute.xlu0 %989 }
 0xd28   :  { %v992_v2 = vadd.f32 %v990_v1, %v986_v40  ;;  %v1205_v40 = vld [vmem:[#allocation5 + $0x70] sm:$0xff]  ;;  %v1206_v1 = vld [vmem:[#allocation5 + $0x78] sm:$0xff] }
 0xd2a   :  { %1688 = vtanh.f32 %v992_v2 }
 0xd34   :  { %v1689_v50 = vpop.eup %1688 }
 0xd35   :  { %v994_v55 = vmul.f32 %v1689_v50, %v1687_v7  ;;  %v1332_v7 = vld [vmem:[%s2283_s5] ss:$0 sm:$0xff] }
 0xd37   :  { %996 = vrot.lane.b32.xlu1 %v994_v55, %s1781_s0 }
 0xda9   :  { %v997_v6 = vpop.permute.xlu1 %996 }
 0xdaa   :  { %1329 = vmatmul.mubr.msk.f32.vlgmr.msra.gmra.mrb[8].mxu1 %vm110_vm0, %v997_v6 }
 0xdab   :  { %1412 = vmatprep.mubr.msk.f32.mxu1 %vm1783_vm3, %v1780_v0  ;;  %v1106_v0 = vld [vmem:[%s2282_s4 + $0x30] sm:$0xff]  ;;  %1573 = vmatpush3.bf16.msra.mxu1 %v1572_v49 }
 0xdac   :  { %v1569_v34 = vpack.c.bf16 %v1107_v28, %v1106_v0  ;;  %1574 = vmatprep.subr.bf16.mxu1 %v1782_v59 }
 0xdaf   :  { %1576 = vmatpush3.bf16.msra.mxu1 %v1575_v35 }
 0xdb0   :  { %1577 = vmatprep.subr.bf16.mxu1 %v1782_v59 }
 0xdb3   :  { %1579 = vmatpush3.bf16.msra.mxu1 %v1578_v38 }
 0xdb4   :  { %1580 = vmatprep.subr.bf16.mxu1 %v1782_v59 }
 0xdb7   :  { %1582 = vmatpush3.bf16.msra.mxu1 %v1581_v42 }
 0xdb8   :  { %1583 = vmatprep.subr.bf16.mxu1 %v1782_v59 }
 0xdbb   :  { %1585 = vmatpush3.bf16.msra.mxu1 %v1584_v33 }
 0xdbc   :  { %1586 = vmatprep.subr.bf16.mxu1 %v1782_v59 }
 0xdbf   :  { %1588 = vmatpush3.bf16.msra.mxu1 %v1587_v5 }
 0xdc0   :  { %1589 = vmatprep.subr.bf16.mxu1 %v1782_v59 }
 0xdc3   :  { %1591 = vmatpush3.bf16.msra.mxu1 %v1590_v47 }
 0xdc4   :  { %1592 = vmatprep.subr.bf16.mxu1 %v1782_v59 }
 0xe7d   :  { %v1066_v9 = vpop.f32.mrb[8].mxu1 }
 0xe7e   :  { %v1071_v43 = vadd.f32 %v1066_v9, %v295_v3  ;;  %v1068_v12 = vpop.f32.mrb[9].mxu1  ;;  %v1103_v3 = vld [vmem:[%s2282_s4 + $0x18] sm:$0xff] }
 0xe7f   :  { %v1072_v13 = vadd.f32 %v1068_v12, %v296_v63  ;;  %v1563_v63 = vpack.c.bf16 %v1103_v3, %v1102_v57 }
 0xe80   :  { %v1330_v8 = vmul.f32 -1.442695, %v1071_v43  ;;  %v1334_v43 = vld [vmem:[%s2285_s7] ss:$0 sm:$0xff] }
 0xe81   :  { %1564 = vmatpush3.bf16.msra.mxu0 %v1563_v63  ;;  %v1331_v54 = vmul.f32 -1.442695, %v1072_v13 }
 0xe82   :  { %1690 = vpow2.f32 %v1330_v8  ;;  %1565 = vmatprep.subr.bf16.mxu0 %v1782_v59 }
 0xe83   :  { %1692 = vtanh.f32 %v1072_v13 }
 0xe85   :  { %1567 = vmatpush3.bf16.msra.mxu0 %v1566_v20 }
 0xe86   :  { %1568 = vmatprep.subr.bf16.mxu0 %v1782_v59 }
 0xe89   :  { %1570 = vmatpush3.bf16.msra.mxu0 %v1569_v34 }
 0xe8c   :  { %v1691_v17 = vpop.eup %1690 }
 0xe8d   :  { %v1079_v23 = vadd.f32 1.0, %v1691_v17  ;;  %v1693_v30 = vpop.eup %1692 }
 0xe8f   :  { %1694 = vrcp.f32 %v1079_v23 }
 0xe90   :  { %1696 = vpow2.f32 %v1331_v54 }
 0xe99   :  { %v1695_v15 = vpop.eup %1694 }
 0xe9a   :  { %v1087_v22 = vmul.f32 %v1695_v15, %v1693_v30  ;;  %v1697_v18 = vpop.eup %1696  ;;  %v1086_v19 = vmul.f32 %v1695_v15, %v992_v2  ;;  %v1593_v2 = vpack.c.bf16 %v1206_v1, %v1205_v40 }
 0xe9b   :  { %v1080_v27 = vadd.f32 1.0, %v1697_v18 }
 0xe9c   :  { %1089 = vrot.lane.b32.xlu0 %v1087_v22, %s1781_s0  ;;  %1594 = vmatpush3.bf16.msra.mxu1 %v1593_v2 }
 0xe9d   :  { %1698 = vrcp.f32 %v1080_v27 }
 0xea7   :  { %v1699_v11 = vpop.eup %1698 }
 0xf0e   :  { %v1090_v32 = vpop.permute.xlu0 %1089 }
 0xf0f   :  { %v1092_v37 = vadd.f32 %v1090_v32, %v1086_v19 }
 0xf11   :  { %1700 = vtanh.f32 %v1092_v37 }
 0xf1b   :  { %v1701_v41 = vpop.eup %1700 }
 0xf1c   :  { %v1094_v10 = vmul.f32 %v1701_v41, %v1699_v11 }
 0xf1e   :  { %v1096_v14 = vrot.slane %v1094_v10, 2 }
 0xf20   :  { %v1098_v29 = vsub.f32 %v1094_v10, %v1096_v14 }
 0xf22   :  { %v1099_v36 = vand.u32 2147483647, %v1098_v29 }
 0xf24   :  { %1116 = vrot.lane.b32.xlu1 %v1099_v36, %s1781_s0 }
 0xf96   :  { %v1117_v52 = vpop.permute.xlu1 %1116 }
 0xf97   :  { %1378 = vmatmul.mubr.msk.f32.vlgmr.msra.gmra.mrb[22].mxu0 %vm110_vm0, %v1117_v52 }
0x106a   :  { %v1186_v50 = vpop.f32.mrb[22].mxu0 }
0x106b   :  { %v1187_v55 = vadd.f32 %v1332_v7, %v1186_v50  ;;  %v1379_v6 = vpop.f32.mrb[23].mxu0 }
0x106d   :  { %v1190_v9 = vmax.f32 %v1187_v55, 0.0 }
0x106f   :  { %1413 = vmatmul.mubr.f32.vlgmr.msra.gmra.mrb[10].mxu1 %v1190_v9 }
0x1142   :  { %v1280_v12 = vpop.f32.mrb[10].mxu1 }
0x1143   :  { %v1281_v13 = vadd.f32 %v1334_v43, %v1280_v12  ;;  %v1414_v8 = vpop.f32.mrb[11].mxu1 }
0x1145   :  { %1284 = vst [vmem:[#allocation7] sm:$0x3] %v1281_v13 }
0x1146   :  { %1757 = shalt.err (!%p1754_p6)
}
0x1147   :  { %s1758_s30 = scalar_lea.hbm %s2286_s8, 32 }
0x1148   :  { %p1759_p7 = scmp.ne.s32.totalorder %s2286_s8, %s1758_s30  ;;  %p1762_p8 = scmp.lt.u32.totalorder %s1758_s30, %s2286_s8 }
0x114a   :  { %p1764_p9 = pnand %p1762_p8, %p1759_p7 }
0x114c   :  { %1767 = shalt.err (!%p1764_p9)
}
0x114d   :  { %1294 = dma.vmem_to_hbm [thread:$0]  %s1292_s29, 32, %s2286_s8, [#allocation4]  }
0x114e   :  { %1772 = dma.done.wait [#allocation4], 32  }
0x114f   :  { %1773 = vsyncadd [#allocation4], 4294967264 }
0x1150   :  { %1298 = vsyncpa [#allocation3], 1 }
0x1151   :  { %1299 = vsyncpa [#allocation6], 1 }
0x1152   :  { %1300 = vsyncpa [#allocation4], 1 }

</bundles_post_ra>
